<compile_context>
chip_gen: v5e
topology: v5e:2x2
jax: 0.10.0
libtpu: 0.0.40
codegen_flags: <defaults>
</compile_context>

<pallas_src>
import jax
import jax.numpy as jnp
from jax.experimental import pallas as pl
from jax.experimental.pallas import tpu as pltpu


# Per-channel scales from the reference module.  The additive offsets
# (+2.12/+2.04/+1.8) cancel in the finite differences, so only 1/scale^2 is
# needed on each channel's sum of squared diffs.
_INV_SCALE_SQ = (1.0 / (4.37 * 4.37), 1.0 / (4.46 * 4.46), 1.0 / (4.44 * 4.44))


def _tv_tile_kernel(x_ref, o_ref):
    # x_ref: (3, TM, W) tile of the image (native dtype), rows fully in-bounds.
    # o_ref: (1, 3, W) f32 per-tile, per-channel partial sums (lane-resolved).
    w = x_ref.shape[-1]
    lane0 = jax.lax.broadcasted_iota(jnp.int32, (1, w), 1) == 0

    for c in range(3):                                  # static channel loop
        xc = x_ref[c].astype(jnp.float32)               # (TM, W)
        # In-tile forward diff along H (cross-tile pairs handled in the wrapper;
        # the global last row's replicate-pad diff is exactly zero).
        dh = xc[1:, :] - xc[:-1, :]                     # (TM-1, W)
        # Forward diff along W (last column's replicate-pad diff is 0, dropped).
        dw = xc[:, 1:] - xc[:, :-1]                     # (TM, W-1)

        # Keep the H contribution lane-resolved (sublane reduce only); fold the
        # W contribution (one scalar per channel) into lane 0 — the wrapper
        # sums everything, so lane placement is irrelevant.
        row = jnp.sum(dh * dh, axis=0, keepdims=True)   # (1, W)
        sw = jnp.sum(dw * dw)                           # scalar
        row = jnp.where(lane0, row + sw, row)
        o_ref[:, c:c + 1, :] = (row * jnp.float32(_INV_SCALE_SQ[c]))[None, :, :]


def _sublane_align(itemsize):
    # Sub-32-bit dtypes pack along sublanes: bf16 vreg is [16,128], int8 [32,128].
    return {4: 8, 2: 16, 1: 32}.get(int(itemsize), 8)


def _vmem_capacity_bytes():
    try:
        info = pltpu.get_tpu_info()
        cap = getattr(info, "vmem_capacity_bytes", None)
        if cap:
            return int(cap)
    except Exception:
        pass
    return 64 * 1024 * 1024     # conservative fallback (v7x per-core VMEM)


def _choose_tile_rows(H, W, itemsize, align, block_budget):
    """Largest aligned H-tile whose working set fits the budget; prefer a divisor of H."""
    # Per image row held live: 2x double-buffered native input block plus ~4
    # f32 temporaries (xc cast, dh, dw, squares) from the unrolled channel loop.
    per_row = 2 * 3 * W * itemsize + 4 * W * 4
    max_rows = max(align, block_budget // per_row)
    max_rows = min(int(max_rows), 512)      # keeps >=2 tiles for large H (megacore)
    if H <= max_rows:
        return int(H)                       # single full-height tile
    # A divisor of H means no remainder rows -> nothing left for the epilogue.
    best = 0
    for cand in range(align, max_rows + 1, align):
        if H % cand == 0:
            best = cand
    if best:
        return best
    return (max_rows // align) * align


def tv_loss_forward(x, weight=1.0, *, tile_rows=None):
    """Mirrors TVLoss.forward: returns `input` unchanged plus the computed TV loss.

    x: NCHW array of shape [1, 3, H, W] (any float dtype; DMA'd natively).
    tile_rows: optional H tile-size override; must be >= H or a positive
               multiple of the dtype's sublane alignment (8 f32 / 16 bf16).
    """
    assert x.ndim == 4 and x.shape[0] == 1 and x.shape[1] == 3, x.shape
    img = jnp.squeeze(x, axis=0)                     # (3, H, W), native dtype
    _, H, W = img.shape
    assert H >= 2 and W >= 2, (H, W)

    itemsize = img.dtype.itemsize
    align = _sublane_align(itemsize)

    # Generation-aware VMEM sizing: ~45 MiB scoped limit on v7x (64 MiB VMEM),
    # ~90 MiB on v5e/v6e (128 MiB VMEM); block budget leaves headroom for the
    # double-buffered DMA windows + f32 temporaries.
    vmem_cap = _vmem_capacity_bytes()
    vmem_limit = int(min(max(32 * 1024 * 1024, int(0.70 * vmem_cap)),
                         100 * 1024 * 1024))
    block_budget = int(0.6 * vmem_limit)

    if tile_rows is None:
        TM = _choose_tile_rows(H, W, itemsize, align, block_budget)
    else:
        TM = int(tile_rows)
        if TM >= H:
            TM = H
        elif TM <= 0 or TM % align != 0:
            raise ValueError(
                f"tile_rows must be >= H ({H}) or a positive multiple of {align} "
                f"for dtype {img.dtype}; got {tile_rows}")
    TM = int(min(TM, H))

    ntiles = H // TM                 # only full tiles run through the kernel
    body_rows = ntiles * TM
    rem = H - body_rows              # trailing rows handled in the JAX epilogue

    flops = 8 * 3 * body_rows * W
    bytes_accessed = 3 * body_rows * W * itemsize + ntiles * 3 * W * 4

    partials = pl.pallas_call(
        _tv_tile_kernel,
        out_shape=jax.ShapeDtypeStruct((ntiles, 3, W), jnp.float32),
        grid_spec=pltpu.PrefetchScalarGridSpec(
            num_scalar_prefetch=0,
            grid=(ntiles,),
            in_specs=[pl.BlockSpec((3, TM, W), lambda i: (0, i, 0))],
            out_specs=pl.BlockSpec((1, 3, W), lambda i: (i, 0, 0)),
        ),
        compiler_params=pltpu.CompilerParams(
            dimension_semantics=("parallel",),      # no cross-tile state -> both v7x TCs
            vmem_limit_bytes=vmem_limit,
        ),
        cost_estimate=pl.CostEstimate(
            flops=flops, transcendentals=0, bytes_accessed=bytes_accessed),
    )(img)

    # Kernel already applied 1/scale^2 per channel; sum everything.
    total = jnp.sum(partials)

    inv = jnp.asarray(_INV_SCALE_SQ, dtype=jnp.float32)[:, None, None]

    # Cross-tile H-boundary pairs (row i*TM-1 <-> i*TM), i = 1..ntiles-1.
    # Reads only 2*(ntiles-1)*3*W extra elements.
    if ntiles > 1:
        top = img[:, TM:body_rows:TM, :].astype(jnp.float32)
        bot = img[:, TM - 1:body_rows - 1:TM, :].astype(jnp.float32)
        d = top - bot
        total = total + jnp.sum(d * d * inv)

    # Remainder rows [body_rows, H): their H pairs (including the boundary into
    # the remainder) and their W diffs.  At most one tile's worth of data; the
    # very last row's replicate-pad diffs are zero and correctly omitted.
    if rem > 0:
        tail = img[:, body_rows - 1:, :].astype(jnp.float32)     # (3, rem+1, W)
        dh = tail[:, 1:, :] - tail[:, :-1, :]
        dw = tail[:, 1:, 1:] - tail[:, 1:, :-1]
        total = total + jnp.sum(dh * dh * inv) + jnp.sum(dw * dw * inv)

    loss = total * jnp.float32(1.0 / (3 * H * W))
    # `weight` is stored but never applied in the reference module; forward
    # returns the input unchanged (loss stashed on the module -> returned here).
    return x, loss


def _tv_loss_ref(x):
    # Pure-JAX reference mirroring the torch code exactly (HWC, concat padding).
    image = jnp.transpose(jnp.squeeze(x, axis=0), (1, 2, 0)).astype(jnp.float32)
    r = (image[:, :, 0] + 2.12) / 4.37
    g = (image[:, :, 1] + 2.04) / 4.46
    b = (image[:, :, 2] + 1.80) / 4.44
    temp = jnp.stack([r, g, b], axis=2)
    gx = jnp.concatenate([temp[1:, :, :], temp[-1:, :, :]], axis=0) - temp
    gy = jnp.concatenate([temp[:, 1:, :], temp[:, -1:, :]], axis=1) - temp
    return jnp.mean(gx ** 2) + jnp.mean(gy ** 2)


if __name__ == "__main__":
    k1, k2, k3 = jax.random.split(jax.random.PRNGKey(0), 3)

    # Single-tile path (NCHW, N=1, C=3).
    x = jax.random.normal(k1, (1, 3, 16, 16), dtype=jnp.float32)
    out, loss = tv_loss_forward(x)
    out = jax.block_until_ready(out)
    loss = jax.block_until_ready(loss)
    ref = _tv_loss_ref(x)
    assert jnp.allclose(loss, ref, rtol=1e-5, atol=1e-6), (loss, ref)
    assert out.shape == x.shape and jnp.array_equal(out, x)

    # Multi-tile, exact-divisor path (cross-tile boundary diffs in the epilogue).
    x2 = jax.random.normal(k2, (1, 3, 24, 16), dtype=jnp.float32)
    _, loss2 = tv_loss_forward(x2, tile_rows=8)
    loss2 = jax.block_until_ready(loss2)
    ref2 = _tv_loss_ref(x2)
    assert jnp.allclose(loss2, ref2, rtol=1e-5, atol=1e-6), (loss2, ref2)

    # Multi-tile with remainder rows (exercises the wrapper remainder epilogue).
    x3 = jax.random.normal(k3, (1, 3, 20, 16), dtype=jnp.float32)
    _, loss3 = tv_loss_forward(x3, tile_rows=8)
    loss3 = jax.block_until_ready(loss3)
    ref3 = _tv_loss_ref(x3)
    assert jnp.allclose(loss3, ref3, rtol=1e-5, atol=1e-6), (loss3, ref3)

    print("KERNEL_OK")
</pallas_src>

<mosaic_0001>
module attributes {stable_mosaic.version = 11 : i64} {
  func.func @_tv_tile_kernel(%arg0: i32, %arg1: memref<3x16x16xf32, #tpu.memory_space<vmem>>, %arg2: memref<1x3x16xf32, #tpu.memory_space<vmem>>) attributes {dimension_semantics = [#tpu.dimension_semantics<parallel>], iteration_bounds = array<i64: 1>, scalar_prefetch = 0 : i64, scratch_operands = 0 : i64, tpu.core_type = #tpu.core_type<tc>, window_params = [{transform_indices = @transform_0, window_bounds = array<i64: 3, 16, 16>}, {transform_indices = @transform_1, window_bounds = array<i64: 1, 3, 16>}]} {
    %0 = tpu.iota {dimensions = array<i32: 1>} : vector<1x16xi32>
    %c0_i32 = arith.constant 0 : i32
    %1 = vector.broadcast %c0_i32 : i32 to vector<1x16xi32>
    %2 = arith.cmpi eq, %0, %1 : vector<1x16xi32>
    %c0 = arith.constant 0 : index
    %c0_0 = arith.constant 0 : index
    %c0_1 = arith.constant 0 : index
    %3 = vector.load %arg1[%c0, %c0_0, %c0_1] : memref<3x16x16xf32, #tpu.memory_space<vmem>>, vector<1x16x16xf32>
    %4 = vector.shape_cast %3 : vector<1x16x16xf32> to vector<16x16xf32>
    %5 = vector.extract_strided_slice %4 {offsets = [1, 0], sizes = [15, 16], strides = [1, 1]} : vector<16x16xf32> to vector<15x16xf32>
    %6 = vector.extract_strided_slice %4 {offsets = [0, 0], sizes = [15, 16], strides = [1, 1]} : vector<16x16xf32> to vector<15x16xf32>
    %7 = arith.subf %5, %6 : vector<15x16xf32>
    %8 = vector.extract_strided_slice %4 {offsets = [0, 1], sizes = [16, 15], strides = [1, 1]} : vector<16x16xf32> to vector<16x15xf32>
    %9 = vector.extract_strided_slice %4 {offsets = [0, 0], sizes = [16, 15], strides = [1, 1]} : vector<16x16xf32> to vector<16x15xf32>
    %10 = arith.subf %8, %9 : vector<16x15xf32>
    %11 = arith.mulf %7, %7 : vector<15x16xf32>
    %cst = arith.constant dense<0.000000e+00> : vector<16xf32>
    %12 = vector.multi_reduction <add>, %11, %cst [0] : vector<15x16xf32> to vector<16xf32>
    %13 = vector.shape_cast %12 : vector<16xf32> to vector<1x16xf32>
    %14 = arith.mulf %10, %10 : vector<16x15xf32>
    %15 = vector.shape_cast %14 : vector<16x15xf32> to vector<1x16x15xf32>
    %cst_2 = arith.constant dense<0.000000e+00> : vector<1xf32>
    %16 = vector.multi_reduction <add>, %15, %cst_2 [1, 2] : vector<1x16x15xf32> to vector<1xf32>
    %17 = vector.shape_cast %16 : vector<1xf32> to vector<1x1x1xf32>
    %18 = vector.extract %17[0, 0, 0] : f32 from vector<1x1x1xf32>
    %19 = vector.broadcast %18 : f32 to vector<1x16xf32>
    %20 = arith.addf %13, %19 : vector<1x16xf32>
    %21 = arith.select %2, %20, %13 : vector<1x16xi1>, vector<1x16xf32>
    %cst_3 = arith.constant 0.0523645207 : f32
    %22 = vector.broadcast %cst_3 : f32 to vector<1x16xf32>
    %23 = arith.mulf %21, %22 : vector<1x16xf32>
    %24 = vector.shape_cast %23 : vector<1x16xf32> to vector<1x1x16xf32>
    %c0_4 = arith.constant 0 : index
    %c0_5 = arith.constant 0 : index
    %c0_6 = arith.constant 0 : index
    %25 = vector.load %arg2[%c0_4, %c0_5, %c0_6] : memref<1x3x16xf32, #tpu.memory_space<vmem>>, vector<1x1x16xf32>
    tpu.vector_store %arg2[%c0_4, %c0_5, %c0_6], %24 {strides = array<i32>} : memref<1x3x16xf32, #tpu.memory_space<vmem>>, vector<1x1x16xf32>,
    %c1 = arith.constant 1 : index
    %c0_7 = arith.constant 0 : index
    %c0_8 = arith.constant 0 : index
    %26 = vector.load %arg1[%c1, %c0_7, %c0_8] : memref<3x16x16xf32, #tpu.memory_space<vmem>>, vector<1x16x16xf32>
    %27 = vector.shape_cast %26 : vector<1x16x16xf32> to vector<16x16xf32>
    %28 = vector.extract_strided_slice %27 {offsets = [1, 0], sizes = [15, 16], strides = [1, 1]} : vector<16x16xf32> to vector<15x16xf32>
    %29 = vector.extract_strided_slice %27 {offsets = [0, 0], sizes = [15, 16], strides = [1, 1]} : vector<16x16xf32> to vector<15x16xf32>
    %30 = arith.subf %28, %29 : vector<15x16xf32>
    %31 = vector.extract_strided_slice %27 {offsets = [0, 1], sizes = [16, 15], strides = [1, 1]} : vector<16x16xf32> to vector<16x15xf32>
    %32 = vector.extract_strided_slice %27 {offsets = [0, 0], sizes = [16, 15], strides = [1, 1]} : vector<16x16xf32> to vector<16x15xf32>
    %33 = arith.subf %31, %32 : vector<16x15xf32>
    %34 = arith.mulf %30, %30 : vector<15x16xf32>
    %cst_9 = arith.constant dense<0.000000e+00> : vector<16xf32>
    %35 = vector.multi_reduction <add>, %34, %cst_9 [0] : vector<15x16xf32> to vector<16xf32>
    %36 = vector.shape_cast %35 : vector<16xf32> to vector<1x16xf32>
    %37 = arith.mulf %33, %33 : vector<16x15xf32>
    %38 = vector.shape_cast %37 : vector<16x15xf32> to vector<1x16x15xf32>
    %cst_10 = arith.constant dense<0.000000e+00> : vector<1xf32>
    %39 = vector.multi_reduction <add>, %38, %cst_10 [1, 2] : vector<1x16x15xf32> to vector<1xf32>
    %40 = vector.shape_cast %39 : vector<1xf32> to vector<1x1x1xf32>
    %41 = vector.extract %40[0, 0, 0] : f32 from vector<1x1x1xf32>
    %42 = vector.broadcast %41 : f32 to vector<1x16xf32>
    %43 = arith.addf %36, %42 : vector<1x16xf32>
    %44 = arith.select %2, %43, %36 : vector<1x16xi1>, vector<1x16xf32>
    %cst_11 = arith.constant 0.0502724759 : f32
    %45 = vector.broadcast %cst_11 : f32 to vector<1x16xf32>
    %46 = arith.mulf %44, %45 : vector<1x16xf32>
    %47 = vector.shape_cast %46 : vector<1x16xf32> to vector<1x1x16xf32>
    %c0_12 = arith.constant 0 : index
    %c1_13 = arith.constant 1 : index
    %c0_14 = arith.constant 0 : index
    %48 = vector.load %arg2[%c0_12, %c1_13, %c0_14] : memref<1x3x16xf32, #tpu.memory_space<vmem>>, vector<1x1x16xf32>
    tpu.vector_store %arg2[%c0_12, %c1_13, %c0_14], %47 {strides = array<i32>} : memref<1x3x16xf32, #tpu.memory_space<vmem>>, vector<1x1x16xf32>,
    %c2 = arith.constant 2 : index
    %c0_15 = arith.constant 0 : index
    %c0_16 = arith.constant 0 : index
    %49 = vector.load %arg1[%c2, %c0_15, %c0_16] : memref<3x16x16xf32, #tpu.memory_space<vmem>>, vector<1x16x16xf32>
    %50 = vector.shape_cast %49 : vector<1x16x16xf32> to vector<16x16xf32>
    %51 = vector.extract_strided_slice %50 {offsets = [1, 0], sizes = [15, 16], strides = [1, 1]} : vector<16x16xf32> to vector<15x16xf32>
    %52 = vector.extract_strided_slice %50 {offsets = [0, 0], sizes = [15, 16], strides = [1, 1]} : vector<16x16xf32> to vector<15x16xf32>
    %53 = arith.subf %51, %52 : vector<15x16xf32>
    %54 = vector.extract_strided_slice %50 {offsets = [0, 1], sizes = [16, 15], strides = [1, 1]} : vector<16x16xf32> to vector<16x15xf32>
    %55 = vector.extract_strided_slice %50 {offsets = [0, 0], sizes = [16, 15], strides = [1, 1]} : vector<16x16xf32> to vector<16x15xf32>
    %56 = arith.subf %54, %55 : vector<16x15xf32>
    %57 = arith.mulf %53, %53 : vector<15x16xf32>
    %cst_17 = arith.constant dense<0.000000e+00> : vector<16xf32>
    %58 = vector.multi_reduction <add>, %57, %cst_17 [0] : vector<15x16xf32> to vector<16xf32>
    %59 = vector.shape_cast %58 : vector<16xf32> to vector<1x16xf32>
    %60 = arith.mulf %56, %56 : vector<16x15xf32>
    %61 = vector.shape_cast %60 : vector<16x15xf32> to vector<1x16x15xf32>
    %cst_18 = arith.constant dense<0.000000e+00> : vector<1xf32>
    %62 = vector.multi_reduction <add>, %61, %cst_18 [1, 2] : vector<1x16x15xf32> to vector<1xf32>
    %63 = vector.shape_cast %62 : vector<1xf32> to vector<1x1x1xf32>
    %64 = vector.extract %63[0, 0, 0] : f32 from vector<1x1x1xf32>
    %65 = vector.broadcast %64 : f32 to vector<1x16xf32>
    %66 = arith.addf %59, %65 : vector<1x16xf32>
    %67 = arith.select %2, %66, %59 : vector<1x16xi1>, vector<1x16xf32>
    %cst_19 = arith.constant 0.0507264026 : f32
    %68 = vector.broadcast %cst_19 : f32 to vector<1x16xf32>
    %69 = arith.mulf %67, %68 : vector<1x16xf32>
    %70 = vector.shape_cast %69 : vector<1x16xf32> to vector<1x1x16xf32>
    %c0_20 = arith.constant 0 : index
    %c2_21 = arith.constant 2 : index
    %c0_22 = arith.constant 0 : index
    %71 = vector.load %arg2[%c0_20, %c2_21, %c0_22] : memref<1x3x16xf32, #tpu.memory_space<vmem>>, vector<1x1x16xf32>
    tpu.vector_store %arg2[%c0_20, %c2_21, %c0_22], %70 {strides = array<i32>} : memref<1x3x16xf32, #tpu.memory_space<vmem>>, vector<1x1x16xf32>,
    return
  }
  func.func @transform_0(%arg0: i32) -> (i32, i32, i32) {
    %c0_i32 = arith.constant 0 : i32
    %c0_i32_0 = arith.constant 0 : i32
    %c0_i32_1 = arith.constant 0 : i32
    return %c0_i32, %arg0, %c0_i32_0 : i32, i32, i32
  }
  func.func @transform_1(%arg0: i32) -> (i32, i32, i32) {
    %c0_i32 = arith.constant 0 : i32
    %c0_i32_0 = arith.constant 0 : i32
    %c0_i32_1 = arith.constant 0 : i32
    return %arg0, %c0_i32, %c0_i32_0 : i32, i32, i32
  }
}

</mosaic_0001>

<bundles_post_ra>
// kernel: tpu_custom_call.1
= control target key start
LH: loop header
LB: loop body
LE: loop exit
PB: predicated region body
PF: predicated region fallthrough
CT: control target
= control target key end

     0   :  { %6 = vsyncpa [#allocation3], 0  ;;  %s269_s9 = smov [#allocation2]   ;;  %s270_s11 = smov 128   ;;  %s338_s0 = inlined_call_operand.hbm [shape: f32[3,16,16], index: 0, kind: input, shape index: {}]   ;;  %s339_s1 = inlined_call_operand.vmem [shape: f32[1,3,16], index: 1, kind: output, shape index: {}]  }
   0x1   :  { %s11_s8 = sshll.u32 %s338_s0, 4  ;;  %s13_s10 = sshll.u32 %s269_s9, 4  ;;  %s12_s8 = int_to_ptr.hbm [resolvable:$true] %s11_s8  ;;  %s14_s10 = int_to_ptr.vmem [resolvable:$true] %s13_s10 }
   0x2   :  { %s271_s12 = smov 8  }
   0x3   :  { %19 = dma.hbm_to_vmem [thread:$0]  %s12_s8, 768, %s14_s10, [#allocation3], %s270_s11, %s270_s11, %s271_s12  }
   0x4   :  { %267 = dma.done.wait [#allocation3], 768  }
   0x5   :  { %268 = vsyncadd [#allocation3], 4294966528  ;;  %v287_v0 = vld [vmem:[#allocation2 + $0x10] sm:$0xff]  ;;  %v289_v1 = vld [vmem:[#allocation2] sm:$0xff]  ;;  %s272_s13 = smov 1   ;;  %s273_s0 = smov 127  }
   0x6   :  { %109 = vrot.lane.b32.xlu1 %v287_v0, %s272_s13  ;;  %39 = vrot.lane.b32.xlu0 %v289_v1, %s272_s13  ;;  %v293_v2 = vld [vmem:[#allocation2 + $0x20] sm:$0xff]  ;;  %v296_v3 = vld [vmem:[#allocation2 + $0x18] sm:$0xff]  ;;  %v298_v4 = vld [vmem:[#allocation2 + $0x8] sm:$0xff]  ;;  %vm78_vm0 = vcmask 121856   ;;  %v32_v53 = vrot.slane %v289_v1, 7  ;;  %v102_v58 = vrot.slane %v287_v0, 7 }
   0x7   :  { %174 = vrot.lane.b32.xlu2 %v293_v2, %s272_s13  ;;  %v300_v5 = vld [vmem:[#allocation2 + $0x28] sm:$0xff]  ;;  %v33_v54 = vrot.slane %v298_v4, 7  ;;  %vm31_vm1 = vcmask 1040384   ;;  %v103_v59 = vrot.slane %v296_v3, 7  ;;  %vm51_vm2 = vcmask 1046528  }
   0x8   :  { %vm57_vm3 = vcmask 130048   ;;  %vm59_vm4 = vcmask 129024   ;;  %vm95_vm6 = vcmask 122880  }
   0x9   :  { %v34_v61 = vsel %vm31_vm1, %v32_v53, %v33_v54  ;;  %v104_v63 = vsel %vm31_vm1, %v102_v58, %v103_v59 }
   0xe   :  { %111 = vrot.lane.b32.xlu1 %v296_v3, %s272_s13  ;;  %41 = vrot.lane.b32.xlu0 %v298_v4, %s272_s13 }
   0xf   :  { %176 = vrot.lane.b32.xlu2 %v300_v5, %s272_s13 }
  0x61   :  { %v175_v6 = vpop.permute.xlu2 %174 }
  0x62   :  { %v180_v22 = vsub.f32 %v293_v2, %v175_v6 }
  0x64   :  { %v200_v23 = vmul.f32 %v180_v22, %v180_v22 }
  0x69   :  { %v177_v13 = vpop.permute.xlu2 %176 }
  0x6a   :  { %v181_v14 = vsub.f32 %v300_v5, %v177_v13 }
  0x6c   :  { %v201_v19 = vmul.f32 %v181_v14, %v181_v14 }
  0x78   :  { %v110_v7 = vpop.permute.xlu1 %109  ;;  %v40_v8 = vpop.permute.xlu0 %39 }
  0x79   :  { %v115_v9 = vsub.f32 %v287_v0, %v110_v7  ;;  %v45_v10 = vsub.f32 %v289_v1, %v40_v8  ;;  %v37_v7 = vsub.f32 %v289_v1, %v32_v53  ;;  %v38_v8 = vsub.f32 %v298_v4, %v34_v61 }
  0x7b   :  { %v135_v11 = vmul.f32 %v115_v9, %v115_v9  ;;  %v68_v12 = vmul.f32 %v45_v10, %v45_v10  ;;  %v167_v9 = vrot.slane %v293_v2, 7  ;;  %v107_v10 = vsub.f32 %v287_v0, %v102_v58 }
  0x7c   :  { %v47_v14 = vmul.f32 %v37_v7, %v37_v7 }
  0x7d   :  { %72 = vrot.lane.b32.xlu0 %v68_v12, %s273_s0  ;;  %139 = vrot.lane.b32.xlu2 %v135_v11, %s273_s0  ;;  %v108_v11 = vsub.f32 %v296_v3, %v104_v63  ;;  %v168_v12 = vrot.slane %v300_v5, 7  ;;  %v172_v1 = vsub.f32 %v293_v2, %v167_v9 }
  0x80   :  { %v112_v15 = vpop.permute.xlu1 %111  ;;  %v42_v16 = vpop.permute.xlu0 %41 }
  0x81   :  { %v116_v17 = vsub.f32 %v296_v3, %v112_v15  ;;  %v46_v18 = vsub.f32 %v298_v4, %v42_v16  ;;  %v48_v15 = vmul.f32 %v38_v8, %v38_v8  ;;  %v117_v16 = vmul.f32 %v107_v10, %v107_v10 }
  0x82   :  { %v182_v3 = vmul.f32 %v172_v1, %v172_v1 }
  0x83   :  { %v136_v20 = vmul.f32 %v116_v17, %v116_v17  ;;  %v69_v21 = vmul.f32 %v46_v18, %v46_v18  ;;  %v118_v17 = vmul.f32 %v108_v11, %v108_v11  ;;  %v169_v18 = vsel %vm31_vm1, %v167_v9, %v168_v12 }
  0x84   :  { %v53_v4 = vrot.slane %v48_v15, 1 }
  0x85   :  { %141 = vrot.lane.b32.xlu0 %v136_v20, %s273_s0  ;;  %74 = vrot.lane.b32.xlu1 %v69_v21, %s273_s0  ;;  %v173_v20 = vsub.f32 %v300_v5, %v169_v18  ;;  %v121_v21 = vrot.slane %v117_v16, 1  ;;  %v122_v0 = vrot.slane %v118_v17, 1 }
  0x86   :  { %206 = vrot.lane.b32.xlu2 %v201_v19, %s273_s0  ;;  %v52_v19 = vrot.slane %v47_v14, 1 }
  0x87   :  { %v183_v22 = vmul.f32 %v173_v20, %v173_v20 }
  0x8d   :  { %204 = vrot.lane.b32.xlu1 %v200_v23, %s273_s0  ;;  %v54_v23 = vsel %vm51_vm2, %v52_v19, %v53_v4 }
  0xd7   :  { %v140_v25 = vpop.permute.xlu2 %139 }
  0xd8   :  { %v145_v28 = vsel %vm78_vm0, %v140_v25, 0.0  ;;  %v58_v25 = vsel %vm57_vm3, %v54_v23, 0.0 }
  0xe0   :  { %v207_v34 = vpop.permute.xlu2 %206 }
  0xe1   :  { %v211_v35 = vsel %vm78_vm0, %v207_v34, 0.0 }
  0xef   :  { %v73_v24 = vpop.permute.xlu0 %72 }
  0xf0   :  { %v79_v29 = vsel %vm78_vm0, %v73_v24, 0.0  ;;  %v123_v24 = vsel %vm51_vm2, %v121_v21, %v122_v0 }
  0xf7   :  { %v75_v26 = vpop.permute.xlu1 %74  ;;  %v142_v27 = vpop.permute.xlu0 %141 }
  0xf8   :  { %v80_v30 = vsel %vm78_vm0, %v75_v26, 0.0  ;;  %v146_v31 = vsel %vm78_vm0, %v142_v27, 0.0  ;;  %v60_v26 = vsel %vm59_vm4, %v53_v4, 0.0  ;;  %v186_v27 = vrot.slane %v182_v3, 1 }
  0xf9   :  { %v81_v32 = vadd.f32 %v80_v30, %v79_v29  ;;  %v147_v33 = vadd.f32 %v146_v31, %v145_v28  ;;  %v187_v28 = vrot.slane %v183_v22, 1  ;;  %v126_v29 = vsel %vm57_vm3, %v123_v24, 0.0 }
  0xfa   :  { %v127_v30 = vsel %vm59_vm4, %v122_v0, 0.0  ;;  %v61_v2 = vadd.f32 %v60_v26, %v58_v25 }
  0xfb   :  { %82 = vadd.xlane.f32.xlu0 %v81_v32  ;;  %148 = vadd.xlane.f32.xlu1 %v147_v33  ;;  %v128_v31 = vadd.f32 %v127_v30, %v126_v29  ;;  %v188_v32 = vsel %vm51_vm2, %v186_v27, %v187_v28 }
  0xfc   :  { %v62_v33 = vrot.slane %v61_v2, 4  ;;  %v191_v34 = vsel %vm57_vm3, %v188_v32, 0.0 }
  0xfd   :  { %v129_v5 = vrot.slane %v128_v31, 4 }
  0xff   :  { %v205_v36 = vpop.permute.xlu1 %204 }
 0x100   :  { %v210_v37 = vsel %vm78_vm0, %v205_v36, 0.0  ;;  %v63_v36 = vadd.f32 %v62_v33, %v61_v2 }
 0x101   :  { %v212_v38 = vadd.f32 %v211_v35, %v210_v37  ;;  %v192_v35 = vsel %vm59_vm4, %v187_v28, 0.0 }
 0x102   :  { %v193_v37 = vadd.f32 %v192_v35, %v191_v34 }
 0x103   :  { %213 = vadd.xlane.f32.xlu2 %v212_v38  ;;  %v130_v38 = vadd.f32 %v129_v5, %v128_v31 }
 0x16e   :  { %v149_v39 = vpop.xlane.xlu1 %148  ;;  %v83_v40 = vpop.xlane.xlu0 %82 }
 0x16f   :  { %v150_v41 = vrot.slane %v149_v39, 4  ;;  %v84_v42 = vrot.slane %v83_v40, 4 }
 0x171   :  { %v151_v43 = vadd.f32 %v150_v41, %v149_v39  ;;  %v85_v44 = vadd.f32 %v84_v42, %v83_v40  ;;  %v64_v39 = vrot.slane %v63_v36, 2  ;;  %v194_v40 = vrot.slane %v193_v37, 4 }
 0x172   :  { %v131_v41 = vrot.slane %v130_v38, 2 }
 0x173   :  { %v152_v45 = vrot.slane %v151_v43, 2  ;;  %v86_v46 = vrot.slane %v85_v44, 2  ;;  %v65_v42 = vadd.f32 %v64_v39, %v63_v36 }
 0x175   :  { %v153_v47 = vadd.f32 %v152_v45, %v151_v43  ;;  %v87_v48 = vadd.f32 %v86_v46, %v85_v44  ;;  %v195_v43 = vadd.f32 %v194_v40, %v193_v37  ;;  %v132_v44 = vadd.f32 %v131_v41, %v130_v38 }
 0x176   :  { %v214_v49 = vpop.xlane.xlu2 %213  ;;  %v24_v45 = vlaneseq  ;;  %v66_v46 = vrot.slane %v65_v42, 1 }
 0x177   :  { %v215_v50 = vrot.slane %v214_v49, 4  ;;  %v88_v51 = vrot.slane %v87_v48, 1  ;;  %v154_v52 = vrot.slane %v153_v47, 1 }
 0x179   :  { %v216_v55 = vadd.f32 %v215_v50, %v214_v49  ;;  %v89_v56 = vadd.f32 %v88_v51, %v87_v48  ;;  %v155_v57 = vadd.f32 %v154_v52, %v153_v47  ;;  %v196_v47 = vrot.slane %v195_v43, 2 }
 0x17a   :  { %v133_v48 = vrot.slane %v132_v44, 1  ;;  %v25_v49 = vand.u32 127, %v24_v45  ;;  %v67_v50 = vadd.f32 %v66_v46, %v65_v42 }
 0x17b   :  { %v217_v60 = vrot.slane %v216_v55, 2  ;;  %232 = vpush %v89_v56  ;;  %v197_v51 = vadd.f32 %v196_v47, %v195_v43 }
 0x17c   :  { %234 = vpush %v155_v57  ;;  %v134_v52 = vadd.f32 %v133_v48, %v132_v44  ;;  %vm26_vm5 = vcmp.eq.s32.totalorder %v25_v49, 0 }
 0x17d   :  { %v218_v62 = vadd.f32 %v217_v60, %v216_v55  ;;  %v198_v56 = vrot.slane %v197_v51, 1 }
 0x17f   :  { %v219_v6 = vrot.slane %v218_v62, 1 }
 0x181   :  { %v220_v13 = vadd.f32 %v219_v6, %v218_v62  ;;  %v199_v62 = vadd.f32 %v198_v56, %v197_v51 }
 0x183   :  { %236 = vpush %v220_v13 }
 0x1ac   :  { %s233_s14 = spop %232 }
 0x1ad   :  { %v91_v53 = vstv %s233_s14  ;;  %s235_s15 = spop %234 }
 0x1ae   :  { %v92_v54 = vadd.f32 %v91_v53, %v67_v50  ;;  %v157_v55 = vstv %s235_s15 }
 0x1af   :  { %v158_v57 = vadd.f32 %v157_v55, %v134_v52 }
 0x1b0   :  { %v93_v58 = vsel %vm26_vm5, %v92_v54, %v67_v50 }
 0x1b1   :  { %v94_v59 = vmul.f32 0.05236452, %v93_v58  ;;  %v159_v60 = vsel %vm26_vm5, %v158_v57, %v134_v52 }
 0x1b2   :  { %v160_v61 = vmul.f32 0.050272476, %v159_v60 }
 0x1b3   :  { %96 = vst.msk [vmem:[%s339_s1] sm:$0x1] %vm95_vm6, %v94_v59 }
 0x1b4   :  { %161 = vst.msk [vmem:[%s339_s1 + $0x1] sm:$0x1] %vm95_vm6, %v160_v61  ;;  %s237_s20 = spop %236 }
 0x1b5   :  { %v222_v63 = vstv %s237_s20 }
 0x1b6   :  { %v223_v6 = vadd.f32 %v222_v63, %v199_v62 }
 0x1b8   :  { %v224_v7 = vsel %vm26_vm5, %v223_v6, %v199_v62 }
 0x1b9   :  { %v225_v8 = vmul.f32 0.050726403, %v224_v7 }
 0x1bb   :  { %226 = vst.msk [vmem:[%s339_s1 + $0x2] sm:$0x1] %vm95_vm6, %v225_v8 }
 0x1bc   :  { %231 = vsyncpa [#allocation3], 1 }

</bundles_post_ra>
